<compile_context>
chip_gen: v7x
topology: tpu7x:2x2x1
jax: 0.10.0
libtpu: 0.0.40
codegen_flags: <defaults>
</compile_context>

<pallas_src>
import numpy as np
import jax
import jax.numpy as jnp
from jax.experimental import pallas as pl
from jax.experimental.pallas import tpu as pltpu


# ----------------------------------------------------------------------------
# Pallas kernel: one batch tile per grid step
# ----------------------------------------------------------------------------
def _d_get_logits_kernel(x_ref, y_ref, w1o_ref, wf_ref, bf_ref, w2_ref, o_ref):
    # Cast activations to bf16 in VMEM (VPU cast, free in this mem-bound
    # regime) instead of materializing bf16 copies in HBM from the wrapper.
    x = x_ref[...].astype(jnp.bfloat16)
    y = y_ref[...].astype(jnp.bfloat16)
    # conv1 (3x3, pad 1, over a fixed 2x2 map) on image features: bf16 MXU matmul
    h1 = jnp.dot(x, w1o_ref[...], preferred_element_type=jnp.float32)
    # folded Linear(768->256) -> conv1 text contribution: one more matmul
    h1 = h1 + jnp.dot(y, wf_ref[...], preferred_element_type=jnp.float32)
    h1 = h1 + bf_ref[...]
    # LeakyReLU(0.2)
    h1 = jnp.where(h1 >= 0, h1, 0.2 * h1)
    # conv2 (2x2 valid over 2x2) == full contraction over (pos, channel).
    # w2 is zero-padded to 128 output lanes -> lane-dense store, logit in col 0.
    # bf16 x bf16 is MXU-native on all target generations.
    o_ref[...] = jnp.dot(h1.astype(jnp.bfloat16), w2_ref[...],
                         preferred_element_type=jnp.float32).astype(o_ref.dtype)


# ----------------------------------------------------------------------------
# One-time weight re-packing (numpy; do NOT run per forward call)
# ----------------------------------------------------------------------------
def pack_d_get_logits_params(W_lin, b_lin, W1, W2, ndf):
    c_img = ndf * 16
    c_mid = ndf * 2
    W_lin = np.asarray(W_lin, np.float32)
    b_lin = np.asarray(b_lin, np.float32)
    W1 = np.asarray(W1, np.float32)
    W2 = np.asarray(W2, np.float32)
    assert W_lin.shape == (256, 768) and b_lin.shape == (256,)
    assert W1.shape == (c_mid, c_img + 256, 3, 3)
    assert W2.shape == (1, c_mid, 2, 2)

    # h1 width padded up to a full lane multiple (>=128)
    n_mid = max(128, ((4 * c_mid + 127) // 128) * 128)

    # x is flattened channel-major / position-minor: col = c*4 + (2*ii + ij),
    # i.e. a plain reshape of the NCHW activation -> no runtime transpose.
    # h1 columns are position-major / channel-minor: col = opos*c_mid + m.
    # For output position (oi,oj) and input position (ii,ij) on the 2x2 grid
    # the 3x3/pad-1 kernel tap is (ii-oi+1, ij-oj+1), always in range.
    w1o = np.zeros((c_img, 4, n_mid), np.float32)
    w1y = np.zeros((256, n_mid), np.float32)
    for oi in range(2):
        for oj in range(2):
            opos = 2 * oi + oj
            sl = slice(opos * c_mid, opos * c_mid + c_mid)
            for ii in range(2):
                for ij in range(2):
                    ipos = 2 * ii + ij
                    ki, kj = ii - oi + 1, ij - oj + 1
                    tap = W1[:, :, ki, kj]                 # (c_mid, c_img+256)
                    w1o[:, ipos, sl] = tap[:, :c_img].T
                    w1y[:, sl] += tap[:, c_img:].T         # text map is spatially const
    w1o = w1o.reshape(4 * c_img, n_mid)

    # Fold the Linear(768->256) into the text path:
    #   y_red @ w1y == y @ (W_lin.T @ w1y) + (b_lin @ w1y)
    w_fold = W_lin.T @ w1y                                 # (768, n_mid)
    b_fold = (b_lin @ w1y).reshape(1, n_mid)               # (1, n_mid)

    # conv2 weight flattened with the same h1 column order; pad to 128 lanes.
    w2 = np.zeros((n_mid, 128), np.float32)
    for ki in range(2):
        for kj in range(2):
            opos = 2 * ki + kj
            w2[opos * c_mid:opos * c_mid + c_mid, 0] = W2[0, :, ki, kj]

    return dict(
        w1o=jnp.asarray(w1o, jnp.bfloat16),
        w_fold=jnp.asarray(w_fold, jnp.bfloat16),
        b_fold=jnp.asarray(b_fold, jnp.float32),
        w2=jnp.asarray(w2, jnp.bfloat16),
        c_img=c_img,
        n_mid=n_mid,
    )


# ----------------------------------------------------------------------------
# Wrapper: batch-tiled pallas_call
# ----------------------------------------------------------------------------
_VMEM_BUDGET = 48 * 1024 * 1024   # fits v7x's 64 MiB/TC with headroom; safe on v5e/v6e


def _round_up(x, m):
    return ((x + m - 1) // m) * m


def _vmem_bytes(tb, k_img, n_mid):
    act = 2 * tb * (k_img + 768) * 4                      # double-buffered f32 input tiles
    out = 2 * tb * 128 * 2                                # double-buffered bf16 output tile
    wts = 2 * ((k_img + 768) * n_mid * 2                  # resident weights, counted 2x
               + n_mid * 4 + n_mid * 128 * 2)             # (default double-buffering)
    return act + out + wts


def d_get_logits_pallas(out_nchw, y, packed, tile_b=1024):
    w1o, w_fold = packed["w1o"], packed["w_fold"]
    b_fold, w2 = packed["b_fold"], packed["w2"]
    c_img, n_mid = packed["c_img"], packed["n_mid"]
    B = out_nchw.shape[0]
    k_img = 4 * c_img
    assert out_nchw.shape == (B, c_img, 2, 2)
    assert y.shape == (B, 768)

    # channel-major / position-minor flatten: contiguous reshape, no transpose,
    # no dtype change (bf16 cast happens inside the kernel).
    x_flat = out_nchw.reshape(B, k_img)

    # ---- batch-tile selection ----------------------------------------------
    if B <= 128:
        tb = B                                            # single block == full dim
    else:
        # >= 2 grid steps so the "parallel" batch axis can shard across the two
        # TensorCores on v7x (one extra, harmless step on single-TC v5e/v6e).
        tb = min(tile_b, _round_up(pl.cdiv(B, 2), 8))
        tb = max(8, (tb // 8) * 8)                        # sublane alignment
    # Shrink the tile until double-buffered tiles + resident weights fit the
    # conservative VMEM budget (v7x only has 64 MiB per TensorCore).
    while tb > 8 and _vmem_bytes(tb, k_img, n_mid) > _VMEM_BUDGET:
        tb = max(8, ((tb // 2) // 8) * 8)
    grid = (pl.cdiv(B, tb),)
    vmem_limit = int(min(_VMEM_BUDGET,
                         max(_vmem_bytes(tb, k_img, n_mid) + (8 << 20), 32 << 20)))

    # Non-divisible grids are handled by Pallas: the last batch block may be
    # partial; its out-of-range rows are garbage but row-independent, and the
    # out-of-range stores are masked, so no jnp.pad pass over HBM is needed.
    out = pl.pallas_call(
        _d_get_logits_kernel,
        out_shape=jax.ShapeDtypeStruct((B, 128), jnp.bfloat16),
        grid_spec=pltpu.PrefetchScalarGridSpec(
            num_scalar_prefetch=0,
            grid=grid,
            in_specs=[
                pl.BlockSpec((tb, k_img), lambda i: (i, 0)),     # x tile (orig dtype)
                pl.BlockSpec((tb, 768), lambda i: (i, 0)),       # y tile (orig dtype)
                pl.BlockSpec((k_img, n_mid), lambda i: (0, 0)),  # resident weights
                pl.BlockSpec((768, n_mid), lambda i: (0, 0)),
                pl.BlockSpec((1, n_mid), lambda i: (0, 0)),
                pl.BlockSpec((n_mid, 128), lambda i: (0, 0)),
            ],
            out_specs=pl.BlockSpec((tb, 128), lambda i: (i, 0)),
        ),
        compiler_params=pltpu.CompilerParams(
            dimension_semantics=("parallel",),          # megacore sharding on v7x
            vmem_limit_bytes=vmem_limit,
        ),
    )(x_flat, y, w1o, w_fold, b_fold, w2)

    # only lane 0 carries the logit; cast back to f32 to match the module.
    return out[:, :1].astype(jnp.float32).reshape(B, 1, 1, 1)


# ----------------------------------------------------------------------------
# Pure-JAX f32 reference matching the PyTorch module
# ----------------------------------------------------------------------------
def d_get_logits_reference(out_nchw, y, W_lin, b_lin, W1, W2):
    B = out_nchw.shape[0]
    y_red = y @ W_lin.T + b_lin                                   # (B, 256)
    y_map = jnp.broadcast_to(y_red[:, :, None, None], (B, 256, 2, 2))
    h = jnp.concatenate([out_nchw, y_map], axis=1)
    h1 = jax.lax.conv_general_dilated(
        h, W1, window_strides=(1, 1), padding=((1, 1), (1, 1)),
        dimension_numbers=("NCHW", "OIHW", "NCHW"))
    h1 = jnp.where(h1 >= 0, h1, 0.2 * h1)
    out = jax.lax.conv_general_dilated(
        h1, W2, window_strides=(1, 1), padding="VALID",
        dimension_numbers=("NCHW", "OIHW", "NCHW"))
    return out                                                    # (B, 1, 1, 1)


if __name__ == "__main__":
    ndf = 4
    key = jax.random.PRNGKey(0)
    k1, k2, k3, k4, k5, k6, k7, k8 = jax.random.split(key, 8)

    # deterministic synthetic parameters (one-time pack)
    W_lin = jax.random.normal(k3, (256, 768), jnp.float32) * 0.02
    b_lin = jax.random.normal(k4, (256,), jnp.float32) * 0.02
    W1 = jax.random.normal(k5, (ndf * 2, ndf * 16 + 256, 3, 3), jnp.float32) * 0.02
    W2 = jax.random.normal(k6, (1, ndf * 2, 2, 2), jnp.float32) * 0.02
    packed = pack_d_get_logits_params(W_lin, b_lin, W1, W2, ndf)

    # --- test 1: tiny batch (single block, block dims == full dims) ---------
    B1 = 2
    out_feat1 = jax.random.normal(k1, (B1, ndf * 16, 2, 2), jnp.float32)
    y_txt1 = jax.random.normal(k2, (B1, 768), jnp.float32)
    res1 = jax.block_until_ready(d_get_logits_pallas(out_feat1, y_txt1, packed))
    ref1 = d_get_logits_reference(out_feat1, y_txt1, W_lin, b_lin, W1, W2)
    np.testing.assert_allclose(np.asarray(res1), np.asarray(ref1),
                               rtol=2e-2, atol=1e-2)   # bf16 MXU path

    # --- test 2: ragged batch exercising the multi-step grid + partial block
    B2 = 200
    out_feat2 = jax.random.normal(k7, (B2, ndf * 16, 2, 2), jnp.float32)
    y_txt2 = jax.random.normal(k8, (B2, 768), jnp.float32)
    res2 = jax.block_until_ready(
        d_get_logits_pallas(out_feat2, y_txt2, packed, tile_b=128))
    ref2 = d_get_logits_reference(out_feat2, y_txt2, W_lin, b_lin, W1, W2)
    np.testing.assert_allclose(np.asarray(res2), np.asarray(ref2),
                               rtol=2e-2, atol=1e-2)

    print("KERNEL_OK")
</pallas_src>

<mosaic_0001>
module attributes {stable_mosaic.version = 11 : i64} {
  func.func @_d_get_logits_kernel(%arg0: i32, %arg1: memref<2x256xf32, #tpu.memory_space<vmem>>, %arg2: memref<2x768xf32, #tpu.memory_space<vmem>>, %arg3: memref<256x128xbf16, #tpu.memory_space<vmem>>, %arg4: memref<768x128xbf16, #tpu.memory_space<vmem>>, %arg5: memref<1x128xf32, #tpu.memory_space<vmem>>, %arg6: memref<128x128xbf16, #tpu.memory_space<vmem>>, %arg7: memref<2x128xbf16, #tpu.memory_space<vmem>>) attributes {dimension_semantics = [#tpu.dimension_semantics<parallel>], iteration_bounds = array<i64: 1>, scalar_prefetch = 0 : i64, scratch_operands = 0 : i64, tpu.core_type = #tpu.core_type<tc>, window_params = [{transform_indices = @transform_0, window_bounds = array<i64: 2, 256>}, {transform_indices = @transform_1, window_bounds = array<i64: 2, 768>}, {pipeline_mode = #tpu.pipeline_mode<synchronous>, transform_indices = @transform_2, window_bounds = array<i64: 256, 128>}, {pipeline_mode = #tpu.pipeline_mode<synchronous>, transform_indices = @transform_3, window_bounds = array<i64: 768, 128>}, {pipeline_mode = #tpu.pipeline_mode<synchronous>, transform_indices = @transform_4, window_bounds = array<i64: 1, 128>}, {pipeline_mode = #tpu.pipeline_mode<synchronous>, transform_indices = @transform_5, window_bounds = array<i64: 128, 128>}, {transform_indices = @transform_6, window_bounds = array<i64: 2, 128>}]} {
    %c0 = arith.constant 0 : index
    %c0_0 = arith.constant 0 : index
    %0 = vector.load %arg1[%c0, %c0_0] : memref<2x256xf32, #tpu.memory_space<vmem>>, vector<2x256xf32>
    %1 = arith.truncf %0 : vector<2x256xf32> to vector<2x256xbf16>
    %c0_1 = arith.constant 0 : index
    %c0_2 = arith.constant 0 : index
    %2 = vector.load %arg2[%c0_1, %c0_2] : memref<2x768xf32, #tpu.memory_space<vmem>>, vector<2x768xf32>
    %3 = arith.truncf %2 : vector<2x768xf32> to vector<2x768xbf16>
    %c0_3 = arith.constant 0 : index
    %c0_4 = arith.constant 0 : index
    %4 = vector.load %arg3[%c0_3, %c0_4] : memref<256x128xbf16, #tpu.memory_space<vmem>>, vector<256x128xbf16>
    %cst = arith.constant dense<0.000000e+00> : vector<2x128xf32>
    %5 = tpu.matmul %1, %4, %cst {dimension_numbers = #tpu.dot_dimension_numbers<[1], [0], [0], [1], [0, 0, 1, 1], [], []>} : vector<2x256xbf16>, vector<256x128xbf16>, vector<2x128xf32> -> vector<2x128xf32>
    %c0_5 = arith.constant 0 : index
    %c0_6 = arith.constant 0 : index
    %6 = vector.load %arg4[%c0_5, %c0_6] : memref<768x128xbf16, #tpu.memory_space<vmem>>, vector<768x128xbf16>
    %cst_7 = arith.constant dense<0.000000e+00> : vector<2x128xf32>
    %7 = tpu.matmul %3, %6, %cst_7 {dimension_numbers = #tpu.dot_dimension_numbers<[1], [0], [0], [1], [0, 0, 1, 1], [], []>} : vector<2x768xbf16>, vector<768x128xbf16>, vector<2x128xf32> -> vector<2x128xf32>
    %8 = arith.addf %5, %7 : vector<2x128xf32>
    %c0_8 = arith.constant 0 : index
    %c0_9 = arith.constant 0 : index
    %9 = vector.load %arg5[%c0_8, %c0_9] : memref<1x128xf32, #tpu.memory_space<vmem>>, vector<1x128xf32>
    %10 = vector.broadcast %9 : vector<1x128xf32> to vector<2x128xf32>
    %11 = arith.addf %8, %10 : vector<2x128xf32>
    %cst_10 = arith.constant 0.000000e+00 : f32
    %12 = vector.broadcast %cst_10 : f32 to vector<2x128xf32>
    %13 = arith.cmpf oge, %11, %12 : vector<2x128xf32>
    %cst_11 = arith.constant 2.000000e-01 : f32
    %14 = vector.broadcast %cst_11 : f32 to vector<2x128xf32>
    %15 = arith.mulf %14, %11 : vector<2x128xf32>
    %16 = arith.select %13, %11, %15 : vector<2x128xi1>, vector<2x128xf32>
    %17 = arith.truncf %16 : vector<2x128xf32> to vector<2x128xbf16>
    %c0_12 = arith.constant 0 : index
    %c0_13 = arith.constant 0 : index
    %18 = vector.load %arg6[%c0_12, %c0_13] : memref<128x128xbf16, #tpu.memory_space<vmem>>, vector<128x128xbf16>
    %cst_14 = arith.constant dense<0.000000e+00> : vector<2x128xf32>
    %19 = tpu.matmul %17, %18, %cst_14 {dimension_numbers = #tpu.dot_dimension_numbers<[1], [0], [0], [1], [0, 0, 1, 1], [], []>} : vector<2x128xbf16>, vector<128x128xbf16>, vector<2x128xf32> -> vector<2x128xf32>
    %20 = arith.truncf %19 : vector<2x128xf32> to vector<2x128xbf16>
    %c0_15 = arith.constant 0 : index
    %c0_16 = arith.constant 0 : index
    %21 = vector.load %arg7[%c0_15, %c0_16] : memref<2x128xbf16, #tpu.memory_space<vmem>>, vector<2x128xbf16>
    tpu.vector_store %arg7[%c0_15, %c0_16], %20 {strides = array<i32>} : memref<2x128xbf16, #tpu.memory_space<vmem>>, vector<2x128xbf16>,
    return
  }
  func.func @transform_0(%arg0: i32) -> (i32, i32) {
    %c0_i32 = arith.constant 0 : i32
    %c0_i32_0 = arith.constant 0 : i32
    return %arg0, %c0_i32 : i32, i32
  }
  func.func @transform_1(%arg0: i32) -> (i32, i32) {
    %c0_i32 = arith.constant 0 : i32
    %c0_i32_0 = arith.constant 0 : i32
    return %arg0, %c0_i32 : i32, i32
  }
  func.func @transform_2(%arg0: i32) -> (i32, i32) {
    %c0_i32 = arith.constant 0 : i32
    %c0_i32_0 = arith.constant 0 : i32
    %c0_i32_1 = arith.constant 0 : i32
    return %c0_i32, %c0_i32_0 : i32, i32
  }
  func.func @transform_3(%arg0: i32) -> (i32, i32) {
    %c0_i32 = arith.constant 0 : i32
    %c0_i32_0 = arith.constant 0 : i32
    %c0_i32_1 = arith.constant 0 : i32
    return %c0_i32, %c0_i32_0 : i32, i32
  }
  func.func @transform_4(%arg0: i32) -> (i32, i32) {
    %c0_i32 = arith.constant 0 : i32
    %c0_i32_0 = arith.constant 0 : i32
    %c0_i32_1 = arith.constant 0 : i32
    return %c0_i32, %c0_i32_0 : i32, i32
  }
  func.func @transform_5(%arg0: i32) -> (i32, i32) {
    %c0_i32 = arith.constant 0 : i32
    %c0_i32_0 = arith.constant 0 : i32
    %c0_i32_1 = arith.constant 0 : i32
    return %c0_i32, %c0_i32_0 : i32, i32
  }
  func.func @transform_6(%arg0: i32) -> (i32, i32) {
    %c0_i32 = arith.constant 0 : i32
    %c0_i32_0 = arith.constant 0 : i32
    return %arg0, %c0_i32 : i32, i32
  }
}

</mosaic_0001>

<bundles_post_ra>
// kernel: tpu_custom_call.1
= control target key start
LH: loop header
LB: loop body
LE: loop exit
PB: predicated region body
PF: predicated region fallthrough
CT: control target
= control target key end

     0   :  { %11 = vsyncpa [#allocation3], 0  ;;  %s1497_s0 = inlined_call_operand.hbm [shape: f32[2,256], index: 0, kind: input, shape index: {}]   ;;  %s1498_s1 = inlined_call_operand.hbm [shape: f32[2,768], index: 1, kind: input, shape index: {}]   ;;  %s1499_s2 = inlined_call_operand.hbm [shape: bf16[256,128], index: 2, kind: input, shape index: {}]   ;;  %s1500_s3 = inlined_call_operand.hbm [shape: bf16[768,128], index: 3, kind: input, shape index: {}]   ;;  %s1501_s4 = inlined_call_operand.vmem [shape: f32[1,128], index: 4, kind: input, shape index: {}]   ;;  %s1502_s5 = inlined_call_operand.hbm [shape: bf16[128,128], index: 5, kind: input, shape index: {}]   ;;  %s1503_s6 = inlined_call_operand.hbm [shape: bf16[2,128], index: 6, kind: output, shape index: {}]  }
   0x1   :  { %12 = vsyncpa [#allocation6], 0 }
   0x2   :  { %13 = vsyncpa [#allocation9], 0 }
   0x3   :  { %14 = vsyncpa [#allocation4], 0  ;;  %s1367_s21 = smov [#allocation5]   ;;  %s1227_s25 = scalar_lea.hbm %s1498_s1, 192 }
   0x4   :  { %s31_s22 = sshll.u32 %s1367_s21, 4  ;;  %p1228_p0 = scmp.ne.s32.totalorder %s1498_s1, %s1227_s25  ;;  %s32_s22 = int_to_ptr.vmem [resolvable:$true] %s31_s22 }
   0x5   :  { %p1231_p1 = scmp.lt.u32.totalorder %s1227_s25, %s1498_s1 }
   0x7   :  { %p1233_p2 = pnand %p1231_p1, %p1228_p0 }
   0x9   :  { %1236 = shalt.err (!%p1233_p2)
}
   0xa   :  { %s1237_s30 = scalar_lea.vmem %s32_s22, 192  ;;  %p1242_p4 = scmp.lt.s32.totalorder %s32_s22, %s32_s22 }
   0xb   :  { %p1238_p3 = scmp.ne.s32.totalorder %s32_s22, %s1237_s30  ;;  %p1243_p5 = scmp.lt.s32.totalorder %s1237_s30, %s1237_s30 }
   0xd   :  { %p1244_p6 = por %p1243_p5, %p1242_p4 }
   0xf   :  { %p1245_p7 = pnand %p1244_p6, %p1238_p3 }
  0x11   :  { %1248 = shalt.err (!%p1245_p7)
}
  0x12   :  { %34 = dma.hbm_to_vmem [thread:$0]  %s1498_s1, 192, %s32_s22, [#allocation6]  }
  0x13   :  { %s1368_s9 = smov [#allocation8]   ;;  %s1369_s11 = smov [#allocation2]  }
  0x14   :  { %s52_s10 = sshll.u32 %s1368_s9, 4  ;;  %s21_s12 = sshll.u32 %s1369_s11, 4  ;;  %s53_s10 = int_to_ptr.vmem [resolvable:$true] %s52_s10  ;;  %s22_s12 = int_to_ptr.vmem [resolvable:$true] %s21_s12 }
  0x15   :  { %s1249_s15 = scalar_lea.hbm %s1500_s3, 6144 }
  0x16   :  { %p1250_p8 = scmp.ne.s32.totalorder %s1500_s3, %s1249_s15  ;;  %p1253_p9 = scmp.lt.u32.totalorder %s1249_s15, %s1500_s3 }
  0x18   :  { %p1255_p10 = pnand %p1253_p9, %p1250_p8 }
  0x1a   :  { %1258 = shalt.err (!%p1255_p10)
}
  0x1b   :  { %s1259_s1 = scalar_lea.vmem %s53_s10, 6144  ;;  %p1264_p12 = scmp.lt.s32.totalorder %s53_s10, %s53_s10 }
  0x1c   :  { %p1260_p11 = scmp.ne.s32.totalorder %s53_s10, %s1259_s1  ;;  %p1265_p13 = scmp.lt.s32.totalorder %s1259_s1, %s1259_s1 }
  0x1e   :  { %p1266_p0 = por %p1265_p13, %p1264_p12 }
  0x20   :  { %p1267_p1 = pnand %p1266_p0, %p1260_p11 }
  0x22   :  { %1270 = shalt.err (!%p1267_p1)
}
  0x23   :  { %s1370_s20 = smov 64   ;;  %s1371_s21 = smov 4  }
  0x24   :  { %58 = dma.hbm_to_vmem [thread:$0]  %s1500_s3, 6144, %s53_s10, [#allocation9], %s1370_s20, %s1370_s20, %s1371_s21  }
  0x25   :  { %s1271_s26 = scalar_lea.hbm %s1497_s0, 64 }
  0x26   :  { %p1272_p2 = scmp.ne.s32.totalorder %s1497_s0, %s1271_s26  ;;  %p1275_p3 = scmp.lt.u32.totalorder %s1271_s26, %s1497_s0 }
  0x28   :  { %p1277_p4 = pnand %p1275_p3, %p1272_p2 }
  0x2a   :  { %1280 = shalt.err (!%p1277_p4)
}
  0x2b   :  { %s1281_s7 = scalar_lea.vmem %s22_s12, 64  ;;  %p1286_p6 = scmp.lt.s32.totalorder %s22_s12, %s22_s12 }
  0x2c   :  { %p1282_p5 = scmp.ne.s32.totalorder %s22_s12, %s1281_s7  ;;  %p1287_p7 = scmp.lt.s32.totalorder %s1281_s7, %s1281_s7 }
  0x2e   :  { %p1288_p8 = por %p1287_p7, %p1286_p6 }
  0x30   :  { %p1289_p9 = pnand %p1288_p8, %p1282_p5 }
  0x32   :  { %1292 = shalt.err (!%p1289_p9)
}
  0x33   :  { %24 = dma.hbm_to_vmem [thread:$0]  %s1497_s0, 64, %s22_s12, [#allocation3]  }
  0x34   :  { %s1372_s9 = smov [#allocation7]   ;;  %s1373_s11 = smov [#allocation10]  }
  0x35   :  { %s40_s10 = sshll.u32 %s1372_s9, 4  ;;  %s66_s13 = sshll.u32 %s1373_s11, 4  ;;  %s41_s10 = int_to_ptr.vmem [resolvable:$true] %s40_s10  ;;  %s67_s13 = int_to_ptr.vmem [resolvable:$true] %s66_s13 }
  0x36   :  { %s1293_s16 = scalar_lea.hbm %s1499_s2, 2048 }
  0x37   :  { %p1294_p10 = scmp.ne.s32.totalorder %s1499_s2, %s1293_s16  ;;  %p1297_p11 = scmp.lt.u32.totalorder %s1293_s16, %s1499_s2 }
  0x39   :  { %p1299_p12 = pnand %p1297_p11, %p1294_p10 }
  0x3b   :  { %1302 = shalt.err (!%p1299_p12)
}
  0x3c   :  { %s1303_s0 = scalar_lea.vmem %s41_s10, 2048  ;;  %p1308_p0 = scmp.lt.s32.totalorder %s41_s10, %s41_s10 }
  0x3d   :  { %p1304_p13 = scmp.ne.s32.totalorder %s41_s10, %s1303_s0  ;;  %p1309_p1 = scmp.lt.s32.totalorder %s1303_s0, %s1303_s0 }
  0x3f   :  { %p1310_p2 = por %p1309_p1, %p1308_p0 }
  0x41   :  { %p1311_p3 = pnand %p1310_p2, %p1304_p13 }
  0x43   :  { %1314 = shalt.err (!%p1311_p3)
}
  0x44   :  { %46 = dma.hbm_to_vmem [thread:$0]  %s1499_s2, 2048, %s41_s10, [#allocation6], %s1370_s20, %s1370_s20, %s1371_s21  }
  0x45   :  { %s1315_s25 = scalar_lea.hbm %s1502_s5, 1024 }
  0x46   :  { %p1316_p4 = scmp.ne.s32.totalorder %s1502_s5, %s1315_s25  ;;  %p1319_p5 = scmp.lt.u32.totalorder %s1315_s25, %s1502_s5 }
  0x48   :  { %p1321_p6 = pnand %p1319_p5, %p1316_p4 }
  0x4a   :  { %1324 = shalt.err (!%p1321_p6)
}
  0x4b   :  { %s1325_s30 = scalar_lea.vmem %s67_s13, 1024  ;;  %p1330_p8 = scmp.lt.s32.totalorder %s67_s13, %s67_s13 }
  0x4c   :  { %p1326_p7 = scmp.ne.s32.totalorder %s67_s13, %s1325_s30  ;;  %p1331_p9 = scmp.lt.s32.totalorder %s1325_s30, %s1325_s30 }
  0x4e   :  { %p1332_p10 = por %p1331_p9, %p1330_p8 }
  0x50   :  { %p1333_p11 = pnand %p1332_p10, %p1326_p7 }
  0x52   :  { %1336 = shalt.err (!%p1333_p11)
}
  0x53   :  { %72 = dma.hbm_to_vmem [thread:$0]  %s1502_s5, 1024, %s67_s13, [#allocation9], %s1370_s20, %s1370_s20, %s1371_s21  }
  0x54   :  { %1359 = dma.done.wait [#allocation3], 64  }
  0x55   :  { %1360 = vsyncadd [#allocation3], 4294967232 }
  0x56   :  { %1361 = dma.done.wait [#allocation6], 2240  }
  0x57   :  { %1362 = vsyncadd [#allocation6], 4294965056 }
  0x58   :  { %1363 = dma.done.wait [#allocation9], 7168  }
  0x59   :  { %1364 = vsyncadd [#allocation9], 4294960128  ;;  %v1154_v0 = vld [vmem:[#allocation8 + $0x40] sm:$0xff]   ;;  %v1158_v4 = vld [vmem:[#allocation8 + $0x48] sm:$0xff]   ;;  %v1374_v22 = vmov 1983009808   ;;  %v111_v24 = vlaneseq }
  0x5a   :  { %v1155_v1 = vld [vmem:[#allocation8 + $0xc0] sm:$0xff]   ;;  %1026 = vmatprep.subr.bf16.mxu0 %v1154_v0  ;;  %v1159_v5 = vld [vmem:[#allocation8 + $0xc8] sm:$0xff]   ;;  %v1162_v8 = vld [vmem:[#allocation8 + $0x50] sm:$0xff]   ;;  %v109_v23 = vunpack.c.l.s4 %v1374_v22  ;;  %vm1376_vm0 = vmmov 0   ;;  %s1377_s21 = smov [#allocation11]  }
  0x5b   :  { %v1156_v2 = vld [vmem:[#allocation8] sm:$0xff]   ;;  %1048 = vmatprep.subr.bf16.mxu1 %v1155_v1  ;;  %v1160_v6 = vld [vmem:[#allocation8 + $0x8] sm:$0xff]   ;;  %v1163_v9 = vld [vmem:[#allocation8 + $0xd0] sm:$0xff]   ;;  %v112_v30 = vshrl.u32 %v111_v24, 7  ;;  %s940_s3 = sshll.u32 %s1377_s21, 4  ;;  %s941_s3 = int_to_ptr.vmem [resolvable:$true] %s940_s3 }
  0x5c   :  { %v1157_v3 = vld [vmem:[#allocation8 + $0x80] sm:$0xff]   ;;  %1027 = vmatpush3.bf16.msra.mxu0 %v1156_v2  ;;  %v1161_v7 = vld [vmem:[#allocation8 + $0x88] sm:$0xff]   ;;  %v1164_v10 = vld [vmem:[#allocation8 + $0x10] sm:$0xff]   ;;  %v110_v29 = vunpack.c.0.s8 %v109_v23  ;;  %s1337_s8 = scalar_lea.vmem %s941_s3, 16  ;;  %p1342_p13 = scmp.lt.s32.totalorder %s941_s3, %s941_s3 }
  0x5d   :  { %1049 = vmatpush3.bf16.msra.mxu1 %v1157_v3  ;;  %1028 = vmatprep.subr.bf16.mxu0 %v1158_v4  ;;  %v1165_v11 = vld [vmem:[#allocation8 + $0x90] sm:$0xff]   ;;  %v1166_v12 = vld [vmem:[#allocation8 + $0x58] sm:$0xff]   ;;  %v1170_v16 = vld [vmem:[#allocation8 + $0x60] sm:$0xff]   ;;  %p1338_p12 = scmp.ne.s32.totalorder %s941_s3, %s1337_s8 }
  0x5e   :  { %1050 = vmatprep.subr.bf16.mxu1 %v1159_v5  ;;  %v1167_v13 = vld [vmem:[#allocation8 + $0xd8] sm:$0xff]   ;;  %v1171_v17 = vld [vmem:[#allocation8 + $0xe0] sm:$0xff]   ;;  %v1174_v20 = vld [vmem:[#allocation8 + $0x68] sm:$0xff]   ;;  %v113_v35 = vsub.s32 %v110_v29, %v112_v30 }
  0x5f   :  { %v1168_v14 = vld [vmem:[#allocation8 + $0x18] sm:$0xff]   ;;  %v1172_v18 = vld [vmem:[#allocation8 + $0x20] sm:$0xff]   ;;  %v1175_v21 = vld [vmem:[#allocation8 + $0xe8] sm:$0xff]  }
  0x60   :  { %1029 = vmatpush3.bf16.msra.mxu0 %v1160_v6  ;;  %v1169_v15 = vld [vmem:[#allocation8 + $0x98] sm:$0xff]   ;;  %v1173_v19 = vld [vmem:[#allocation8 + $0xa0] sm:$0xff]   ;;  %v1176_v25 = vld [vmem:[#allocation8 + $0x28] sm:$0xff]  }
  0x61   :  { %1051 = vmatpush3.bf16.msra.mxu1 %v1161_v7  ;;  %1030 = vmatprep.subr.bf16.mxu0 %v1162_v8  ;;  %v1177_v26 = vld [vmem:[#allocation8 + $0xa8] sm:$0xff]   ;;  %v1178_v27 = vld [vmem:[#allocation8 + $0x70] sm:$0xff]   ;;  %v1182_v33 = vld [vmem:[#allocation8 + $0x78] sm:$0xff]  }
  0x62   :  { %1052 = vmatprep.subr.bf16.mxu1 %v1163_v9  ;;  %v1179_v28 = vld [vmem:[#allocation8 + $0xf0] sm:$0xff]   ;;  %v1183_v34 = vld [vmem:[#allocation8 + $0xf8] sm:$0xff]   ;;  %v1187_v41 = vld [vmem:[#allocation8 + $0x140] sm:$0xff]  }
  0x63   :  { %v1180_v31 = vld [vmem:[#allocation8 + $0x30] sm:$0xff]   ;;  %v1184_v36 = vld [vmem:[#allocation8 + $0x38] sm:$0xff]   ;;  %v1188_v42 = vld [vmem:[#allocation7 + $0x40] sm:$0xff]  }
  0x64   :  { %1031 = vmatpush3.bf16.msra.mxu0 %v1164_v10  ;;  %v1181_v32 = vld [vmem:[#allocation8 + $0xb0] sm:$0xff]   ;;  %v1185_v37 = vld [vmem:[#allocation8 + $0xb8] sm:$0xff]   ;;  %v1189_v48 = vld [vmem:[#allocation8 + $0x100] sm:$0xff]  }
  0x65   :  { %1053 = vmatpush3.bf16.msra.mxu1 %v1165_v11  ;;  %1032 = vmatprep.subr.bf16.mxu0 %v1166_v12  ;;  %v103_v38 = vld [vmem:[#allocation5] sm:$0xff]  ;;  %v1191_v50 = vld [vmem:[#allocation8 + $0x148] sm:$0xff]   ;;  %v1190_v52 = vld [vmem:[#allocation7] sm:$0xff]  }
  0x66   :  { %1054 = vmatprep.subr.bf16.mxu1 %v1167_v13  ;;  %v114_v39 = vrot.slane %v103_v38, %v113_v35  ;;  %v107_v40 = vcombine.high %v103_v38, %v103_v38  ;;  %v1192_v53 = vld [vmem:[#allocation7 + $0x48] sm:$0xff]   ;;  %v1195_v55 = vld [vmem:[#allocation8 + $0x150] sm:$0xff]   ;;  %v1199_v59 = vld [vmem:[#allocation8 + $0x158] sm:$0xff]  }
  0x67   :  { %v1193_v54 = vld [vmem:[#allocation8 + $0x108] sm:$0xff]   ;;  %v1196_v57 = vld [vmem:[#allocation7 + $0x50] sm:$0xff]   ;;  %v1200_v61 = vld [vmem:[#allocation7 + $0x58] sm:$0xff]  }
  0x68   :  { %1033 = vmatpush3.bf16.msra.mxu0 %v1168_v14  ;;  %v122_v43 = vcombine.high %v114_v39, %v114_v39  ;;  %v121_v44 = vrot.slane %v107_v40, %v113_v35  ;;  %v138_v45 = vpack.c.bf16 %v114_v39, %v114_v39  ;;  %v1194_v56 = vld [vmem:[#allocation7 + $0x8] sm:$0xff]   ;;  %v1197_v58 = vld [vmem:[#allocation8 + $0x110] sm:$0xff]   ;;  %v1201_v62 = vld [vmem:[#allocation8 + $0x118] sm:$0xff]  }
  0x69   :  { %1055 = vmatpush3.bf16.msra.mxu1 %v1169_v15  ;;  %1034 = vmatprep.subr.bf16.mxu0 %v1170_v16  ;;  %v1198_v60 = vld [vmem:[#allocation7 + $0x10] sm:$0xff]   ;;  %v1203_v63 = vld [vmem:[#allocation8 + $0x160] sm:$0xff]   ;;  %v1202_v0 = vld [vmem:[#allocation7 + $0x18] sm:$0xff]  }
  0x6a   :  { %1056 = vmatprep.subr.bf16.mxu1 %v1171_v17  ;;  %v139_v46 = vpack.c.bf16 %v122_v43, %v122_v43  ;;  %v123_v47 = vcombine.high %v121_v44, %v121_v44  ;;  %v140_v49 = vpack.c.bf16 %v121_v44, %v121_v44  ;;  %v1204_v1 = vld [vmem:[#allocation7 + $0x60] sm:$0xff]   ;;  %v1207_v3 = vld [vmem:[#allocation8 + $0x168] sm:$0xff]   ;;  %v1211_v7 = vld [vmem:[#allocation8 + $0x170] sm:$0xff]  }
  0x6b   :  { %v1205_v2 = vld [vmem:[#allocation8 + $0x120] sm:$0xff]   ;;  %v1208_v5 = vld [vmem:[#allocation7 + $0x68] sm:$0xff]   ;;  %v1212_v9 = vld [vmem:[#allocation7 + $0x70] sm:$0xff]  }
  0x6c   :  { %1035 = vmatpush3.bf16.msra.mxu0 %v1172_v18  ;;  %592 = vmatprep.mubr.bf16.mxu0 %v139_v46  ;;  %v141_v51 = vpack.c.bf16 %v123_v47, %v123_v47  ;;  %v1206_v4 = vld [vmem:[#allocation7 + $0x20] sm:$0xff]   ;;  %v1209_v6 = vld [vmem:[#allocation8 + $0x128] sm:$0xff]   ;;  %v1213_v10 = vld [vmem:[#allocation8 + $0x130] sm:$0xff]  }
  0x6d   :  { %1057 = vmatpush3.bf16.msra.mxu1 %v1173_v19  ;;  %1036 = vmatprep.subr.bf16.mxu0 %v1174_v20  ;;  %v1210_v8 = vld [vmem:[#allocation7 + $0x28] sm:$0xff]   ;;  %v1215_v11 = vld [vmem:[#allocation8 + $0x178] sm:$0xff]   ;;  %v1214_v12 = vld [vmem:[#allocation7 + $0x30] sm:$0xff]  }
  0x6e   :  { %1058 = vmatprep.subr.bf16.mxu1 %v1175_v21  ;;  %632 = vmatprep.mubr.bf16.mxu1 %v141_v51  ;;  %v1216_v13 = vld [vmem:[#allocation7 + $0x78] sm:$0xff]   ;;  %v951_v18 = vld.sshfl [vmem:[#allocation2] sm:$0x33 pattern:$0x76325410]  ;;  %v1219_v24 = vld [vmem:[#allocation10] sm:$0xff]  }
  0x6f   :  { %v1217_v14 = vld [vmem:[#allocation8 + $0x138] sm:$0xff]   ;;  %v98_v19 = vcombine.high %v951_v18, %v951_v18  ;;  %v101_v23 = vpack.c.bf16 %v951_v18, %v951_v18  ;;  %v1223_v29 = vld [vmem:[#allocation10 + $0x20] sm:$0xff]   ;;  %v1224_v30 = vld [vmem:[#allocation10 + $0x28] sm:$0xff]  }
  0x70   :  { %1037 = vmatpush3.bf16.msra.mxu0 %v1176_v25  ;;  %v952_v15 = vld.sshfl [vmem:[#allocation5 + $0x8] sm:$0x33 pattern:$0x76325410]  ;;  %v1375_v25 = vmov 0.0  }
  0x71   :  { %1059 = vmatpush3.bf16.msra.mxu1 %v1177_v26  ;;  %1038 = vmatprep.subr.bf16.mxu0 %v1178_v27  ;;  %v1218_v16 = vld [vmem:[#allocation7 + $0x38] sm:$0xff]   ;;  %v131_v17 = vcombine.high %v952_v15, %v952_v15  ;;  %v142_v21 = vpack.c.bf16 %v952_v15, %v952_v15  ;;  %v102_v22 = vpack.c.bf16 %v98_v19, %v98_v19  ;;  %v1220_v26 = vld [vmem:[#allocation10 + $0x8] sm:$0xff]   ;;  %v1221_v27 = vld [vmem:[#allocation10 + $0x10] sm:$0xff]  }
  0x72   :  { %1060 = vmatprep.subr.bf16.mxu1 %v1179_v28  ;;  %v1222_v28 = vld [vmem:[#allocation10 + $0x18] sm:$0xff]  }
  0x73   :  { %v143_v20 = vpack.c.bf16 %v131_v17, %v131_v17 }
  0x74   :  { %1039 = vmatpush3.bf16.msra.mxu0 %v1180_v31  ;;  %v1225_v31 = vld [vmem:[#allocation10 + $0x30] sm:$0xff]  }
  0x75   :  { %1061 = vmatpush3.bf16.msra.mxu1 %v1181_v32  ;;  %1040 = vmatprep.subr.bf16.mxu0 %v1182_v33  ;;  %v1226_v32 = vld [vmem:[#allocation10 + $0x38] sm:$0xff]  }
  0x76   :  { %1062 = vmatprep.subr.bf16.mxu1 %v1183_v34 }
  0x78   :  { %1041 = vmatpush3.bf16.msra.mxu0 %v1184_v36 }
  0x79   :  { %1063 = vmatpush3.bf16.msra.mxu1 %v1185_v37  ;;  %1070 = vmatprep.subr.bf16.mxu0 %v1187_v41 }
  0x7a   :  { %1092 = vmatprep.subr.bf16.mxu1 %v1188_v42 }
  0x7b   :  { %593 = vmatmul.mubr.bf16.vlgmr.msra.gmra.mrb[0].mxu0 %v138_v45 }
  0x7c   :  { %1071 = vmatpush3.bf16.msra.mxu0 %v1189_v48  ;;  %633 = vmatmul.mubr.bf16.vlgmr.msra.gmra.mrb[0].mxu1 %v140_v49 }
  0x7d   :  { %1072 = vmatprep.subr.bf16.mxu0 %v1191_v50  ;;  %1093 = vmatpush3.bf16.msra.mxu1 %v1190_v52 }
  0x7e   :  { %1094 = vmatprep.subr.bf16.mxu1 %v1192_v53  ;;  %672 = vmatprep.mubr.bf16.mxu0 %v143_v20 }
  0x7f   :  { %808 = vmatprep.mubr.bf16.mxu1 %v102_v22 }
  0x80   :  { %1073 = vmatpush3.bf16.msra.mxu0 %v1193_v54  ;;  %v1017_v54 = vld [vmem:[%s1501_s4] ss:$0 sm:$0xff]  ;;  %s1341_s4 = scalar_lea.vmem %s941_s3, 32 }
  0x81   :  { %1074 = vmatprep.subr.bf16.mxu0 %v1195_v55  ;;  %1095 = vmatpush3.bf16.msra.mxu1 %v1194_v56  ;;  %p1343_p0 = scmp.lt.s32.totalorder %s1341_s4, %s1337_s8 }
  0x82   :  { %1096 = vmatprep.subr.bf16.mxu1 %v1196_v57 }
  0x83   :  { %p1344_p1 = por %p1343_p0, %p1342_p13 }
  0x84   :  { %1075 = vmatpush3.bf16.msra.mxu0 %v1197_v58 }
  0x85   :  { %1076 = vmatprep.subr.bf16.mxu0 %v1199_v59  ;;  %1097 = vmatpush3.bf16.msra.mxu1 %v1198_v60  ;;  %p1345_p2 = pnand %p1344_p1, %p1338_p12 }
  0x86   :  { %1098 = vmatprep.subr.bf16.mxu1 %v1200_v61 }
  0x88   :  { %1077 = vmatpush3.bf16.msra.mxu0 %v1201_v62 }
  0x89   :  { %1078 = vmatprep.subr.bf16.mxu0 %v1203_v63  ;;  %1099 = vmatpush3.bf16.msra.mxu1 %v1202_v0 }
  0x8a   :  { %1100 = vmatprep.subr.bf16.mxu1 %v1204_v1 }
  0x8c   :  { %1079 = vmatpush3.bf16.msra.mxu0 %v1205_v2 }
  0x8d   :  { %1080 = vmatprep.subr.bf16.mxu0 %v1207_v3  ;;  %1101 = vmatpush3.bf16.msra.mxu1 %v1206_v4 }
  0x8e   :  { %1102 = vmatprep.subr.bf16.mxu1 %v1208_v5 }
  0x90   :  { %1081 = vmatpush3.bf16.msra.mxu0 %v1209_v6 }
  0x91   :  { %1082 = vmatprep.subr.bf16.mxu0 %v1211_v7  ;;  %1103 = vmatpush3.bf16.msra.mxu1 %v1210_v8 }
  0x92   :  { %1104 = vmatprep.subr.bf16.mxu1 %v1212_v9 }
  0x94   :  { %1083 = vmatpush3.bf16.msra.mxu0 %v1213_v10 }
  0x95   :  { %1084 = vmatprep.subr.bf16.mxu0 %v1215_v11  ;;  %1105 = vmatpush3.bf16.msra.mxu1 %v1214_v12 }
  0x96   :  { %1106 = vmatprep.subr.bf16.mxu1 %v1216_v13 }
  0x98   :  { %1085 = vmatpush3.bf16.msra.mxu0 %v1217_v14 }
  0x99   :  { %1107 = vmatpush3.bf16.msra.mxu1 %v1218_v16  ;;  %1123 = vmatprep.subr.bf16.mxu0 %v1375_v25 }
  0x9b   :  { %673 = vmatmul.mubr.bf16.vlgmr.msra.gmra.mrb[4].mxu0 %v142_v21 }
  0x9c   :  { %809 = vmatmul.mubr.bf16.vlgmr.msra.gmra.mrb[4].mxu1 %v101_v23  ;;  %1124 = vmatpush3.bf16.msra.mxu0 %v1219_v24 }
  0x9d   :  { %1125 = vmatprep.subr.bf16.mxu0 %v1375_v25  ;;  %1139 = vmatprep.mubr.msk.bf16.mxu0 %vm1376_vm0, %v1375_v25 }
  0xa0   :  { %1126 = vmatpush3.bf16.msra.mxu0 %v1220_v26 }
  0xa1   :  { %1127 = vmatprep.subr.bf16.mxu0 %v1375_v25 }
  0xa4   :  { %1128 = vmatpush3.bf16.msra.mxu0 %v1221_v27 }
  0xa5   :  { %1129 = vmatprep.subr.bf16.mxu0 %v1375_v25 }
  0xa8   :  { %1130 = vmatpush3.bf16.msra.mxu0 %v1222_v28 }
  0xa9   :  { %1131 = vmatprep.subr.bf16.mxu0 %v1375_v25 }
  0xac   :  { %1132 = vmatpush3.bf16.msra.mxu0 %v1223_v29 }
  0xad   :  { %1133 = vmatprep.subr.bf16.mxu0 %v1375_v25 }
  0xb0   :  { %1134 = vmatpush3.bf16.msra.mxu0 %v1224_v30 }
  0xb1   :  { %1135 = vmatprep.subr.bf16.mxu0 %v1375_v25 }
  0xb4   :  { %1136 = vmatpush3.bf16.msra.mxu0 %v1225_v31 }
  0xb5   :  { %1137 = vmatprep.subr.bf16.mxu0 %v1375_v25 }
  0xb8   :  { %1138 = vmatpush3.bf16.msra.mxu0 %v1226_v32 }
 0x14e   :  { %v1042_v33 = vpop.f32.mrb[0].mxu0 }
 0x14f   :  { %v1043_v34 = vpop.f32.mrb[1].mxu0  ;;  %v1064_v35 = vpop.f32.mrb[0].mxu1 }
 0x150   :  { %v1044_v36 = vadd.f32 %v1043_v34, %v1042_v33  ;;  %v1045_v37 = vpop.f32.mrb[2].mxu0  ;;  %v1065_v38 = vpop.f32.mrb[1].mxu1 }
 0x151   :  { %v1046_v39 = vpop.f32.mrb[3].mxu0  ;;  %v1066_v40 = vadd.f32 %v1065_v38, %v1064_v35  ;;  %v1067_v41 = vpop.f32.mrb[2].mxu1 }
 0x152   :  { %v1068_v42 = vpop.f32.mrb[3].mxu1 }
 0x153   :  { %v635_v43 = vadd.f32 %v1066_v40, %v1044_v36 }
 0x16e   :  { %v1086_v44 = vpop.f32.mrb[4].mxu0 }
 0x16f   :  { %v1087_v45 = vpop.f32.mrb[5].mxu0  ;;  %v1108_v46 = vpop.f32.mrb[4].mxu1 }
 0x170   :  { %v1088_v47 = vadd.f32 %v1087_v45, %v1086_v44  ;;  %v1089_v48 = vpop.f32.mrb[6].mxu0  ;;  %v1109_v49 = vpop.f32.mrb[5].mxu1 }
 0x171   :  { %v1090_v50 = vpop.f32.mrb[7].mxu0  ;;  %v1110_v52 = vadd.f32 %v1109_v49, %v1108_v46  ;;  %v1111_v53 = vpop.f32.mrb[6].mxu1 }
 0x172   :  { %v675_v51 = vadd.f32 %v1088_v47, %v635_v43  ;;  %v1112_v55 = vpop.f32.mrb[7].mxu1 }
 0x174   :  { %v811_v56 = vadd.f32 %v1110_v52, %v675_v51 }
 0x176   :  { %v823_v57 = vadd.f32 %v1017_v54, %v811_v56 }
 0x178   :  { %vm824_vm1 = vcmp.ge.f32.partialorder %v823_v57, 0.0  ;;  %v825_v58 = vmul.f32 0.2, %v823_v57 }
 0x17a   :  { %v826_v59 = vsel %vm824_vm1, %v823_v57, %v825_v58 }
 0x17b   :  { %v827_v60 = vpack.c.bf16 %v826_v59, %v826_v59 }
 0x17d   :  { %1140 = vmatmul.mubr.bf16.vlgmr.msra.gmra.mrb[8].mxu0 %v827_v60 }
 0x250   :  { %v926_v61 = vpop.f32.mrb[8].mxu0 }
 0x251   :  { %v932_v62 = vpack.c.bf16 %v926_v61, %v926_v61  ;;  %v1141_v63 = vpop.f32.mrb[9].mxu0 }
 0x252   :  { %v929_v0 = vpop.f32.mrb[10].mxu0 }
 0x253   :  { %933 = vst [vmem:[#allocation11] sm:$0x1] %v932_v62  ;;  %v1142_v1 = vpop.f32.mrb[11].mxu0 }
 0x254   :  { %1348 = shalt.err (!%p1345_p2)
}
 0x255   :  { %s1349_s11 = scalar_lea.hbm %s1503_s6, 16 }
 0x256   :  { %p1350_p3 = scmp.ne.s32.totalorder %s1503_s6, %s1349_s11  ;;  %p1353_p4 = scmp.lt.u32.totalorder %s1349_s11, %s1503_s6 }
 0x258   :  { %p1355_p5 = pnand %p1353_p4, %p1350_p3 }
 0x25a   :  { %1358 = shalt.err (!%p1355_p5)
}
 0x25b   :  { %943 = dma.vmem_to_hbm [thread:$0]  %s941_s3, 16, %s1503_s6, [#allocation4]  }
 0x25c   :  { %1365 = dma.done.wait [#allocation4], 16  }
 0x25d   :  { %1366 = vsyncadd [#allocation4], 4294967280 }
 0x25e   :  { %947 = vsyncpa [#allocation3], 1 }
 0x25f   :  { %948 = vsyncpa [#allocation6], 1 }
 0x260   :  { %949 = vsyncpa [#allocation9], 1 }
 0x261   :  { %950 = vsyncpa [#allocation4], 1 }

</bundles_post_ra>
